<compile_context>
chip_gen: v5e
topology: v5e:2x2
jax: 0.10.0
libtpu: 0.0.40
codegen_flags: <defaults>
</compile_context>

<pallas_src>
import functools

import jax
import jax.numpy as jnp
import numpy as np
from jax.experimental import pallas as pl
from jax.experimental.pallas import tpu as pltpu

# Scoped-VMEM budget requested from Mosaic.  With the 4 MiB largest-buffer
# tile target below, worst-case live buffers are ~16 MiB (double-buffered
# in + out), so 32 MiB is safe on every generation (v5e/v6e: 128 MiB physical,
# v7x: 64 MiB physical) while lifting v5e's 16 MiB scoped default.
_VMEM_LIMIT_BYTES = 32 * 1024 * 1024

# Per-largest-buffer tile target.  ~4 MiB keeps the fixed ~0.35us per-grid-step
# cost small even at v7x HBM bandwidth while staying well inside the VMEM
# budget above on v5e.
# TODO(synk): per-generation sweep (v5e ~2 MiB, v7x 8 MiB + pl.Buffered(3) on
# the grouped input) once benchmarked on hardware.
_TARGET_TILE_BYTES = 4 << 20


def _copy_kernel(x_ref, o_ref):
    # The input BlockSpec already selected only the kept frame (first D lanes
    # of each factor*D group), so this is a straight lane-dense copy; dropped
    # frames are never DMA'd from HBM.
    o_ref[...] = x_ref[...]


def _make_strided_kernel(factor, itemsize):
    def kernel(x_ref, o_ref):
        rows = o_ref.shape[0]
        if itemsize == 4:
            # Strided ref read: only kept rows are pulled into vregs (no
            # full-tile load + in-register sublane gather).
            o_ref[...] = x_ref[pl.ds(0, rows, stride=factor), :]
        else:
            # TODO(synk): validate sublane-strided ref reads for packed
            # (sub-32-bit) dtypes; keep the conservative in-register drop here.
            x = x_ref[...]
            o_ref[...] = x[::factor, :]
    return kernel


def _choose_rows(total_rows, largest_row_bytes, requested=None):
    """Rows per output tile: ~4 MiB for the biggest buffer, rows % 32 == 0
    (or == total_rows, which is always layout-legal as a full dim)."""
    if requested is not None:
        rows = int(requested)
    else:
        rows = _TARGET_TILE_BYTES // max(1, largest_row_bytes)
    rows = max(32, (rows // 32) * 32)
    return int(min(rows, total_rows))


@functools.lru_cache(maxsize=None)
def _grouped_rows_call(rows_out, factor, D, dtype, tt):
    """xs viewed as (B*T_out, factor*D): kept frames only (lane-block 0)."""
    n = pl.cdiv(rows_out, tt)
    itemsize = jnp.dtype(dtype).itemsize
    cost = pl.CostEstimate(
        flops=0, transcendentals=0,
        bytes_accessed=int(2 * rows_out * D * itemsize))
    return pl.pallas_call(
        _copy_kernel,
        grid=(n,),
        in_specs=[
            # Lane-block 0 of the (rows, factor*D) view == the kept frame of
            # every group; dropped frames are never fetched from HBM.
            pl.BlockSpec((tt, D), lambda i: (i, 0)),
        ],
        out_specs=pl.BlockSpec((tt, D), lambda i: (i, 0)),
        out_shape=jax.ShapeDtypeStruct((rows_out, D), dtype),
        compiler_params=pltpu.CompilerParams(
            dimension_semantics=("parallel",),
            vmem_limit_bytes=_VMEM_LIMIT_BYTES),
        cost_estimate=cost,
    )


@functools.lru_cache(maxsize=None)
def _strided_rows_call(rows_in, rows_out, factor, D, dtype, tt):
    """xs viewed as (B*T, D): contiguous reads, strided in-VMEM row drop."""
    n = pl.cdiv(rows_out, tt)
    in_tt = rows_in if n == 1 else tt * factor
    itemsize = jnp.dtype(dtype).itemsize
    cost = pl.CostEstimate(
        flops=0, transcendentals=0,
        bytes_accessed=int((rows_in + rows_out) * D * itemsize))
    return pl.pallas_call(
        _make_strided_kernel(factor, itemsize),
        grid=(n,),
        in_specs=[pl.BlockSpec((in_tt, D), lambda i: (i, 0))],
        out_specs=pl.BlockSpec((tt, D), lambda i: (i, 0)),
        out_shape=jax.ShapeDtypeStruct((rows_out, D), dtype),
        compiler_params=pltpu.CompilerParams(
            dimension_semantics=("parallel",),
            vmem_limit_bytes=_VMEM_LIMIT_BYTES),
        cost_estimate=cost,
    )


@functools.lru_cache(maxsize=None)
def _batched_strided_call(B, T, T_out, factor, D, dtype, tt):
    """T % factor != 0: no free grouped/flattened view, tile per batch row."""
    nt = pl.cdiv(T_out, tt)
    in_tt = T if nt == 1 else tt * factor
    itemsize = jnp.dtype(dtype).itemsize
    cost = pl.CostEstimate(
        flops=0, transcendentals=0,
        bytes_accessed=int(B * (T + T_out) * D * itemsize))
    return pl.pallas_call(
        _make_strided_kernel(factor, itemsize),
        grid=(B, nt),
        in_specs=[
            pl.BlockSpec((pl.Squeezed(), in_tt, D), lambda b, t: (b, t, 0)),
        ],
        out_specs=pl.BlockSpec((pl.Squeezed(), tt, D), lambda b, t: (b, t, 0)),
        out_shape=jax.ShapeDtypeStruct((B, T_out, D), dtype),
        compiler_params=pltpu.CompilerParams(
            dimension_semantics=("parallel", "parallel"),
            vmem_limit_bytes=_VMEM_LIMIT_BYTES),
        cost_estimate=cost,
    )


def drop_subsampler(xs, xlens, factor, *, min_pallas_bytes=256 * 1024,
                    time_tile=None):
    """JAX/Pallas equivalent of DropSubsampler.forward.

    xs:    [B, T, D] float array
    xlens: [B]       int array of valid lengths
    """
    xlens = jnp.asarray(xlens, dtype=jnp.int32)
    if factor == 1:
        return xs, xlens

    B, T, D = xs.shape
    T_out = -(-T // factor)  # ceil(T / factor)

    # Length update: B trivial int ops -> plain XLA, not the kernel.
    ylens = jnp.maximum(jnp.int32(1), (xlens + (factor - 1)) // factor)

    itemsize = jnp.dtype(xs.dtype).itemsize
    if B * T * D * itemsize < min_pallas_bytes:
        # Tiny problem: per-grid-step / launch overhead dominates; XLA slice.
        return xs[:, ::factor, :], ylens

    if T % factor == 0:
        # Batch folds into the row axis (free reshapes on contiguous data):
        # 1-D grid over rows, tiles stay at the target size regardless of the
        # B/T split, single balanced "parallel" axis for v7x megacore.
        rows_out = B * T_out
        if D % 128 == 0:
            # Grouped fast path: only the kept frame of each group is DMA'd.
            # TODO(synk): for very small kept chunks (bf16 D=128, factor=2 ->
            # 256 B) benchmark against the contiguous-read strided path (HBM
            # transaction granularity may eat the 1/factor traffic saving).
            xs_g = xs.reshape(B * T_out, factor * D)
            tt = _choose_rows(rows_out, D * itemsize, time_tile)
            ys = _grouped_rows_call(rows_out, factor, D, xs.dtype, tt)(xs_g)
        else:
            xs_r = xs.reshape(B * T, D)
            tt = _choose_rows(rows_out, factor * D * itemsize, time_tile)
            ys = _strided_rows_call(B * T, rows_out, factor, D,
                                    xs.dtype, tt)(xs_r)
        return ys.reshape(B, T_out, D), ylens

    # T % factor != 0: a grouped view would need jnp.pad (a full extra HBM
    # read+write of xs), so use the per-batch strided path instead.
    tt = _choose_rows(T_out, factor * D * itemsize, time_tile)
    ys = _batched_strided_call(B, T, T_out, factor, D, xs.dtype, tt)(xs)
    return ys, ylens


if __name__ == "__main__":
    key = jax.random.PRNGKey(0)

    def reference(xs, xlens, factor):
        xs_np = np.asarray(xs)
        ref_ys = xs_np[:, ::factor, :]
        ref_ylens = np.array(
            [max(1, (int(i) + factor - 1) // factor) for i in np.asarray(xlens)],
            dtype=np.int32)
        return ref_ys, ref_ylens

    def check(xs, xlens, factor, **kw):
        ys, ylens = drop_subsampler(xs, xlens, factor, **kw)
        ys = jax.block_until_ready(ys)
        ylens = jax.block_until_ready(ylens)
        ref_ys, ref_ylens = reference(xs, xlens, factor)
        assert ys.shape == ref_ys.shape, (ys.shape, ref_ys.shape)
        assert ys.dtype == xs.dtype, (ys.dtype, xs.dtype)
        np.testing.assert_array_equal(np.asarray(ys), ref_ys)
        np.testing.assert_array_equal(np.asarray(ylens), ref_ylens)

    k1, k2, k3, k4, k5 = jax.random.split(key, 5)

    # 1) Grouped fast path, single block (T % factor == 0, D % 128 == 0).
    xs = jax.random.normal(k1, (2, 48, 128), dtype=jnp.float32)
    xlens = jnp.array([48, 20], dtype=jnp.int32)
    check(xs, xlens, 3, min_pallas_bytes=0)

    # 2) Grouped path, multi-tile with ragged last block.
    xs2 = jax.random.normal(k2, (2, 330, 128), dtype=jnp.float32)
    xlens2 = jnp.array([330, 200], dtype=jnp.int32)
    check(xs2, xlens2, 3, min_pallas_bytes=0, time_tile=32)

    # 3) Per-batch strided path (T % factor != 0), ragged input/output tiles.
    xs3 = jax.random.normal(k3, (2, 331, 128), dtype=jnp.float32)
    xlens3 = jnp.array([331, 200], dtype=jnp.int32)
    check(xs3, xlens3, 3, min_pallas_bytes=0, time_tile=32)

    # 4) Fused-rows strided path (D not a multiple of 128), multi-tile ragged.
    xs4 = jax.random.normal(k4, (1, 300, 32), dtype=jnp.float32)
    xlens4 = jnp.array([300], dtype=jnp.int32)
    check(xs4, xlens4, 4, min_pallas_bytes=0, time_tile=32)

    # 5) Fused-rows strided path, small single block.
    xs5 = jax.random.normal(k5, (2, 16, 32), dtype=jnp.float32)
    xlens5 = jnp.array([16, 10], dtype=jnp.int32)
    check(xs5, xlens5, 2, min_pallas_bytes=0)

    # 6) Per-batch strided path, small D, T % factor != 0.
    check(xs5, xlens5, 3, min_pallas_bytes=0)

    # 7) bf16 on the grouped (pure copy) path.
    xs7 = jax.random.normal(k1, (2, 12, 128), dtype=jnp.bfloat16)
    xlens7 = jnp.array([12, 7], dtype=jnp.int32)
    check(xs7, xlens7, 2, min_pallas_bytes=0)

    # 8) factor == 1 passthrough.
    ys1, ylens1 = drop_subsampler(xs5, xlens5, 1)
    np.testing.assert_array_equal(np.asarray(ys1), np.asarray(xs5))
    np.testing.assert_array_equal(np.asarray(ylens1), np.asarray(xlens5))

    # 9) Tiny-problem XLA fallback (default threshold).
    check(xs5, xlens5, 3)

    print("KERNEL_OK")
</pallas_src>

<mosaic_0001>
module attributes {stable_mosaic.version = 11 : i64} {
  func.func @_copy_kernel(%arg0: i32, %arg1: memref<32x128xf32, #tpu.memory_space<vmem>>, %arg2: memref<32x128xf32, #tpu.memory_space<vmem>>) attributes {dimension_semantics = [#tpu.dimension_semantics<parallel>], iteration_bounds = array<i64: 1>, scalar_prefetch = 0 : i64, scratch_operands = 0 : i64, tpu.core_type = #tpu.core_type<tc>, window_params = [{transform_indices = @transform_0, window_bounds = array<i64: 32, 128>}, {transform_indices = @transform_1, window_bounds = array<i64: 32, 128>}]} {
    %c0 = arith.constant 0 : index
    %c0_0 = arith.constant 0 : index
    %0 = vector.load %arg1[%c0, %c0_0] : memref<32x128xf32, #tpu.memory_space<vmem>>, vector<32x128xf32>
    %c0_1 = arith.constant 0 : index
    %c0_2 = arith.constant 0 : index
    %1 = vector.load %arg2[%c0_1, %c0_2] : memref<32x128xf32, #tpu.memory_space<vmem>>, vector<32x128xf32>
    tpu.vector_store %arg2[%c0_1, %c0_2], %0 {strides = array<i32>} : memref<32x128xf32, #tpu.memory_space<vmem>>, vector<32x128xf32>,
    return
  }
  func.func @transform_0(%arg0: i32) -> (i32, i32) {
    %c0_i32 = arith.constant 0 : i32
    %c0_i32_0 = arith.constant 0 : i32
    return %arg0, %c0_i32 : i32, i32
  }
  func.func @transform_1(%arg0: i32) -> (i32, i32) {
    %c0_i32 = arith.constant 0 : i32
    %c0_i32_0 = arith.constant 0 : i32
    return %arg0, %c0_i32 : i32, i32
  }
}

</mosaic_0001>

<bundles_post_ra>
// kernel: tpu_custom_call.1
= control target key start
LH: loop header
LB: loop body
LE: loop exit
PB: predicated region body
PF: predicated region fallthrough
CT: control target
= control target key end

     0   :  { %6 = vsyncpa [#allocation3], 0  ;;  %s130_s0 = inlined_call_operand.hbm [shape: f32[32,384], index: 0, kind: input, shape index: {}]   ;;  %s131_s1 = inlined_call_operand.hbm [shape: f32[32,128], index: 1, kind: output, shape index: {}]  }
   0x1   :  { %7 = vsyncpa [#allocation4], 0  ;;  %s12_s8 = sshll.u32 %s130_s0, 4  ;;  %s109_s9 = smov [#allocation2]   ;;  %s13_s8 = int_to_ptr.hbm [resolvable:$true] %s12_s8 }
   0x2   :  { %s14_s10 = sshll.u32 %s109_s9, 4  ;;  %s110_s11 = smov 384   ;;  %s15_s10 = int_to_ptr.vmem [resolvable:$true] %s14_s10 }
   0x3   :  { %s111_s12 = smov 128   ;;  %s112_s13 = smov 8  }
   0x4   :  { %20 = dma.hbm_to_vmem [thread:$0]  %s13_s8, 512, %s15_s10, [#allocation3], %s110_s11, %s111_s12, %s112_s13  }
   0x5   :  { %105 = dma.done.wait [#allocation3], 512  }
   0x6   :  { %106 = vsyncadd [#allocation3], 4294966784  ;;  %s113_s14 = smov [#allocation5]   ;;  %s39_s18 = sshll.u32 %s131_s1, 4  ;;  %v25_v0 = vld [vmem:[#allocation2] sm:$0xff]  ;;  %v26_v1 = vld [vmem:[#allocation2 + $0x8] sm:$0xff]  ;;  %s40_s18 = int_to_ptr.hbm [resolvable:$true] %s39_s18 }
   0x7   :  { %s37_s15 = sshll.u32 %s113_s14, 4  ;;  %v27_v2 = vld [vmem:[#allocation2 + $0x10] sm:$0xff]  ;;  %29 = vst [vmem:[#allocation5] sm:$0xff] %v25_v0  ;;  %v28_v3 = vld [vmem:[#allocation2 + $0x18] sm:$0xff]  ;;  %s38_s15 = int_to_ptr.vmem [resolvable:$true] %s37_s15 }
   0x8   :  { %30 = vst [vmem:[#allocation5 + $0x8] sm:$0xff] %v26_v1 }
   0x9   :  { %31 = vst [vmem:[#allocation5 + $0x10] sm:$0xff] %v27_v2 }
   0xa   :  { %32 = vst [vmem:[#allocation5 + $0x18] sm:$0xff] %v28_v3 }
   0xb   :  { %45 = dma.vmem_to_hbm [thread:$0]  %s38_s15, 512, %s40_s18, [#allocation4], %s111_s12, %s111_s12, %s112_s13  }
   0xc   :  { %107 = dma.done.wait [#allocation4], 512  }
   0xd   :  { %108 = vsyncadd [#allocation4], 4294966784 }
   0xe   :  { %50 = vsyncpa [#allocation3], 1 }
   0xf   :  { %51 = vsyncpa [#allocation4], 1 }

</bundles_post_ra>
